<compile_context>
chip_gen: v7x
topology: tpu7x:2x2x1
jax: 0.10.0
libtpu: 0.0.40
codegen_flags: <defaults>
</compile_context>

<pallas_src>
import jax
import jax.numpy as jnp
from jax.experimental import pallas as pl
from jax.experimental.pallas import tpu as pltpu

_TARGET_TM = 1024  # target lane-axis (spatial) tile; 128-aligned, far below VMEM budget here.


def _fused_multiconv_kernel(x_ref, *refs):
    """Fused [1x1 conv -> BN(eval) -> ReLU] x n_layers on one activation tile.

    x_ref : (1, C0, tm)  input tile; channels on sublanes, spatial (H*W) on lanes.
    refs  : (w_0, shift_0, ..., w_{L-1}, shift_{L-1}, o_ref)
        w_i     : (C_{i+1}, C_i)  conv weight with BN scale pre-folded in
        shift_i : (C_{i+1}, 1)    folded conv-bias/BN shift (broadcast over lanes)
    o_ref : (1, C_L, tm)  final-layer output tile (lane-dense store).
    """
    o_ref = refs[-1]
    layer_refs = refs[:-1]

    a = x_ref[0]  # (C0, tm) float32
    for i in range(0, len(layer_refs), 2):
        w = layer_refs[i][...]          # (Cout, Cin) -- BN scale already folded in
        shift = layer_refs[i + 1][...]  # (Cout, 1)
        y = jnp.dot(w, a, preferred_element_type=jnp.float32)  # (Cout, tm) on MXU
        a = jnp.maximum(y + shift, 0.0)                         # lane-dense VPU epilogue
    o_ref[0] = a.astype(o_ref.dtype)


def init_multi_conv1x1_params(key, channels):
    """Deterministic params mirroring the PyTorch module (eval-mode BN), pre-folded.

    Per layer i: conv weight [C_{i+1}, C_i, 1, 1], conv bias, BN gamma/beta/mean/var.
    Folded into: w' = (gamma/sqrt(var+eps))[:,None] * w,  shift = scale*(b-mean)+beta.
    """
    params = []
    eps = 1e-5
    n_layers = len(channels) - 1
    keys = jax.random.split(key, n_layers * 4)
    for i in range(n_layers):
        cin, cout = channels[i], channels[i + 1]
        kw, kb, kg, kbt = keys[4 * i: 4 * i + 4]
        bound = 1.0 / float(cin) ** 0.5  # PyTorch Conv2d default init bound
        w4 = jax.random.uniform(kw, (cout, cin, 1, 1), jnp.float32, -bound, bound)
        b = jax.random.uniform(kb, (cout,), jnp.float32, -bound, bound)
        gamma = 1.0 + 0.1 * jax.random.normal(kg, (cout,), jnp.float32)
        beta = 0.1 * jax.random.normal(kbt, (cout,), jnp.float32)
        running_mean = jnp.zeros((cout,), jnp.float32)
        running_var = jnp.ones((cout,), jnp.float32)

        scale = gamma / jnp.sqrt(running_var + eps)            # [Cout]
        w_folded = w4[:, :, 0, 0] * scale[:, None]             # [Cout, Cin]
        shift = (scale * (b - running_mean) + beta).reshape(cout, 1)
        params.append((w_folded, shift))
    return params


@jax.jit
def multi_conv1x1_forward(x_nchw, params):
    """x_nchw: [B, C0, H, W] -> [B, C_last, H, W] (float32, eval-mode BN)."""
    B, C0, H, W = x_nchw.shape
    M = H * W
    C_last = params[-1][0].shape[0]

    # Spatial (lane-axis) tile: largest 128-multiple up to _TARGET_TM; pad M to a multiple.
    tm = min(_TARGET_TM, pl.cdiv(M, 128) * 128)
    Mp = pl.cdiv(M, tm) * tm

    x3 = x_nchw.reshape(B, C0, M)          # free reshape, no transpose needed for 1x1 conv
    if Mp != M:
        x3 = jnp.pad(x3, ((0, 0), (0, 0), (0, Mp - M)))

    grid = (B, Mp // tm)

    in_specs = [pl.BlockSpec((1, C0, tm), lambda b, m: (b, 0, m))]
    operands = [x3]
    flops = 0
    weight_bytes = 0
    for (w, shift) in params:
        cout, cin = w.shape
        # Constant index_map => weights/shifts are fetched once, not re-DMA'd per step.
        in_specs.append(pl.BlockSpec((cout, cin), lambda b, m: (0, 0)))
        in_specs.append(pl.BlockSpec((cout, 1), lambda b, m: (0, 0)))
        operands.extend([w, shift])
        flops += 2 * B * M * cin * cout
        weight_bytes += w.size * 4 + shift.size * 4

    cost = pl.CostEstimate(
        flops=flops,
        transcendentals=0,
        bytes_accessed=B * C0 * M * 4 + B * C_last * M * 4 + weight_bytes,
    )

    out = pl.pallas_call(
        _fused_multiconv_kernel,
        out_shape=jax.ShapeDtypeStruct((B, C_last, Mp), jnp.float32),
        grid_spec=pltpu.PrefetchScalarGridSpec(
            num_scalar_prefetch=0,
            grid=grid,
            in_specs=in_specs,
            out_specs=pl.BlockSpec((1, C_last, tm), lambda b, m: (b, 0, m)),
        ),
        compiler_params=pltpu.CompilerParams(
            dimension_semantics=("parallel", "parallel"),
            vmem_limit_bytes=32 * 1024 * 1024,  # explicit, safe on v5e/v6e/v7x (tiles are tiny)
        ),
        cost_estimate=cost,
    )(*operands)

    if Mp != M:
        out = out[:, :, :M]
    return out.reshape(B, C_last, H, W)


def _reference_forward(x_nchw, params):
    """Pure-JAX reference with the same eval-mode folded semantics."""
    B, C0, H, W = x_nchw.shape
    a = x_nchw.reshape(B, C0, H * W)
    for (w, shift) in params:
        a = jnp.maximum(jnp.einsum("oc,bcm->bom", w, a) + shift[None, :, :], 0.0)
    return a.reshape(B, -1, H, W)


if __name__ == "__main__":
    key = jax.random.PRNGKey(0)
    k_x, k_p = jax.random.split(key)

    # channels = [4, 8, 16], n_layers = 2 (len(channels) == n_layers + 1)
    channels = [4, 8, 16]
    B, H, W = 2, 16, 16
    x = jax.random.normal(k_x, (B, channels[0], H, W), jnp.float32)
    params = init_multi_conv1x1_params(k_p, channels)

    out = multi_conv1x1_forward(x, params)
    out = jax.block_until_ready(out)

    ref = _reference_forward(x, params)
    assert out.shape == (B, channels[-1], H, W)
    assert jnp.allclose(out, ref, atol=1e-5, rtol=1e-5), float(jnp.max(jnp.abs(out - ref)))

    # TODO(synk): BatchNorm training-mode (batch-statistics + running-stat update) is not
    # implemented; the kernel realizes eval-mode BN folded into the conv weights.
    print("KERNEL_OK")
</pallas_src>

<mosaic_0001>
module attributes {stable_mosaic.version = 11 : i64} {
  func.func @_fused_multiconv_kernel(%arg0: i32, %arg1: i32, %arg2: memref<1x4x256xf32, #tpu.memory_space<vmem>>, %arg3: memref<8x4xf32, #tpu.memory_space<vmem>>, %arg4: memref<8x1xf32, #tpu.memory_space<vmem>>, %arg5: memref<16x8xf32, #tpu.memory_space<vmem>>, %arg6: memref<16x1xf32, #tpu.memory_space<vmem>>, %arg7: memref<1x16x256xf32, #tpu.memory_space<vmem>>) attributes {dimension_semantics = [#tpu.dimension_semantics<parallel>, #tpu.dimension_semantics<parallel>], iteration_bounds = array<i64: 2, 1>, scalar_prefetch = 0 : i64, scratch_operands = 0 : i64, tpu.core_type = #tpu.core_type<tc>, window_params = [{transform_indices = @transform_0, window_bounds = array<i64: 1, 4, 256>}, {pipeline_mode = #tpu.pipeline_mode<synchronous>, transform_indices = @transform_1, window_bounds = array<i64: 8, 4>}, {pipeline_mode = #tpu.pipeline_mode<synchronous>, transform_indices = @transform_2, window_bounds = array<i64: 8, 1>}, {pipeline_mode = #tpu.pipeline_mode<synchronous>, transform_indices = @transform_3, window_bounds = array<i64: 16, 8>}, {pipeline_mode = #tpu.pipeline_mode<synchronous>, transform_indices = @transform_4, window_bounds = array<i64: 16, 1>}, {transform_indices = @transform_5, window_bounds = array<i64: 1, 16, 256>}]} {
    %c0 = arith.constant 0 : index
    %c0_0 = arith.constant 0 : index
    %c0_1 = arith.constant 0 : index
    %0 = vector.load %arg2[%c0, %c0_0, %c0_1] : memref<1x4x256xf32, #tpu.memory_space<vmem>>, vector<1x4x256xf32>
    %1 = vector.shape_cast %0 : vector<1x4x256xf32> to vector<4x256xf32>
    %c0_2 = arith.constant 0 : index
    %c0_3 = arith.constant 0 : index
    %2 = vector.load %arg3[%c0_2, %c0_3] : memref<8x4xf32, #tpu.memory_space<vmem>>, vector<8x4xf32>
    %c0_4 = arith.constant 0 : index
    %c0_5 = arith.constant 0 : index
    %3 = vector.load %arg4[%c0_4, %c0_5] : memref<8x1xf32, #tpu.memory_space<vmem>>, vector<8x1xf32>
    %cst = arith.constant dense<0.000000e+00> : vector<8x256xf32>
    %4 = tpu.matmul %2, %1, %cst {dimension_numbers = #tpu.dot_dimension_numbers<[1], [0], [0], [1], [0, 0, 1, 1], [], []>} : vector<8x4xf32>, vector<4x256xf32>, vector<8x256xf32> -> vector<8x256xf32>
    %5 = vector.broadcast %3 : vector<8x1xf32> to vector<8x256xf32>
    %6 = arith.addf %4, %5 : vector<8x256xf32>
    %cst_6 = arith.constant 0.000000e+00 : f32
    %7 = vector.broadcast %cst_6 : f32 to vector<8x256xf32>
    %8 = arith.maximumf %6, %7 : vector<8x256xf32>
    %c0_7 = arith.constant 0 : index
    %c0_8 = arith.constant 0 : index
    %9 = vector.load %arg5[%c0_7, %c0_8] : memref<16x8xf32, #tpu.memory_space<vmem>>, vector<16x8xf32>
    %c0_9 = arith.constant 0 : index
    %c0_10 = arith.constant 0 : index
    %10 = vector.load %arg6[%c0_9, %c0_10] : memref<16x1xf32, #tpu.memory_space<vmem>>, vector<16x1xf32>
    %cst_11 = arith.constant dense<0.000000e+00> : vector<16x256xf32>
    %11 = tpu.matmul %9, %8, %cst_11 {dimension_numbers = #tpu.dot_dimension_numbers<[1], [0], [0], [1], [0, 0, 1, 1], [], []>} : vector<16x8xf32>, vector<8x256xf32>, vector<16x256xf32> -> vector<16x256xf32>
    %12 = vector.broadcast %10 : vector<16x1xf32> to vector<16x256xf32>
    %13 = arith.addf %11, %12 : vector<16x256xf32>
    %cst_12 = arith.constant 0.000000e+00 : f32
    %14 = vector.broadcast %cst_12 : f32 to vector<16x256xf32>
    %15 = arith.maximumf %13, %14 : vector<16x256xf32>
    %c0_13 = arith.constant 0 : index
    %c0_14 = arith.constant 0 : index
    %c0_15 = arith.constant 0 : index
    %16 = vector.load %arg7[%c0_13, %c0_14, %c0_15] : memref<1x16x256xf32, #tpu.memory_space<vmem>>, vector<1x16x256xf32>
    %17 = vector.shape_cast %16 : vector<1x16x256xf32> to vector<16x256xf32>
    %18 = vector.shape_cast %15 : vector<16x256xf32> to vector<1x16x256xf32>
    tpu.vector_store %arg7[%c0_13, %c0_14, %c0_15], %18 {strides = array<i32>} : memref<1x16x256xf32, #tpu.memory_space<vmem>>, vector<1x16x256xf32>,
    return
  }
  func.func @transform_0(%arg0: i32, %arg1: i32) -> (i32, i32, i32) {
    %c0_i32 = arith.constant 0 : i32
    %c0_i32_0 = arith.constant 0 : i32
    return %arg0, %c0_i32, %arg1 : i32, i32, i32
  }
  func.func @transform_1(%arg0: i32, %arg1: i32) -> (i32, i32) {
    %c0_i32 = arith.constant 0 : i32
    %c0_i32_0 = arith.constant 0 : i32
    %c0_i32_1 = arith.constant 0 : i32
    return %c0_i32, %c0_i32_0 : i32, i32
  }
  func.func @transform_2(%arg0: i32, %arg1: i32) -> (i32, i32) {
    %c0_i32 = arith.constant 0 : i32
    %c0_i32_0 = arith.constant 0 : i32
    %c0_i32_1 = arith.constant 0 : i32
    return %c0_i32, %c0_i32_0 : i32, i32
  }
  func.func @transform_3(%arg0: i32, %arg1: i32) -> (i32, i32) {
    %c0_i32 = arith.constant 0 : i32
    %c0_i32_0 = arith.constant 0 : i32
    %c0_i32_1 = arith.constant 0 : i32
    return %c0_i32, %c0_i32_0 : i32, i32
  }
  func.func @transform_4(%arg0: i32, %arg1: i32) -> (i32, i32) {
    %c0_i32 = arith.constant 0 : i32
    %c0_i32_0 = arith.constant 0 : i32
    %c0_i32_1 = arith.constant 0 : i32
    return %c0_i32, %c0_i32_0 : i32, i32
  }
  func.func @transform_5(%arg0: i32, %arg1: i32) -> (i32, i32, i32) {
    %c0_i32 = arith.constant 0 : i32
    %c0_i32_0 = arith.constant 0 : i32
    return %arg0, %c0_i32, %arg1 : i32, i32, i32
  }
}

</mosaic_0001>

<bundles_post_ra>
// kernel: multi_conv1x1_forward.1
= control target key start
LH: loop header
LB: loop body
LE: loop exit
PB: predicated region body
PF: predicated region fallthrough
CT: control target
= control target key end

     0   :  { %s652_s18 = smov 0   ;;  %s654_s19 = smov 0   ;;  %s707_s0 = inlined_call_operand.vmem [shape: f32[2,4,256], index: 0, kind: input, shape index: {}]   ;;  %s708_s1 = inlined_call_operand.vmem [shape: f32[8,4], index: 1, kind: input, shape index: {}]   ;;  %s709_s2 = inlined_call_operand.vmem [shape: f32[8,1], index: 2, kind: input, shape index: {}]   ;;  %s710_s3 = inlined_call_operand.vmem [shape: f32[16,8], index: 3, kind: input, shape index: {}]   ;;  %s711_s4 = inlined_call_operand.vmem [shape: f32[16,1], index: 4, kind: input, shape index: {}]   ;;  %s712_s5 = inlined_call_operand.vmem [shape: f32[2,16,256], index: 5, kind: output, shape index: {}]  }
   0x1   :  { %s656_s20 = smov 0  }
   0x2 LB: > { %s27_s21 = sadd.s32 1, %s614_s19  ;;  %p553_p0 = scmp.ge.s32.totalorder %s618_s20, 1  ;;  %s618_s20 = sphi %s656_s20, %s15_s20   ;;  %s614_s19 = sphi %s654_s19, %s714_s19   ;;  %s610_s18 = sphi %s652_s18, %s713_s18  }
   0x3   : > { %p29_p1 = scmp.ge.s32.totalorder %s27_s21, 2  ;;  %p208_p2 = scmp.lt.s32.totalorder %s618_s20, 3 }
   0x5   : > { %s716_s21 = smov (%p29_p1, %s27_s21), 0  ;;  %p209_p3 = pnand %p553_p0, %p208_p2 }
   0x6   : > { %p245_p4 = scmp.lt.s32.totalorder (!%p209_p3), %s610_s18, 1  ;;  %v620_v0 = vmov (!%p209_p3), 0.0   ;;  %v621_v1 = vmov (!%p209_p3), 0   ;;  %v266_v2 = vld [vmem:[%s709_s2] sm:$0xff] (!%p209_p3)  ;;  %vm278_vm0 = vcmask (!%p209_p3), 1043456   ;;  %vm274_vm1 = vcmask (!%p209_p3), 31744  }
   0x7   : > { %212 = sbr.rel (%p209_p3) target bundleno = 463 (0x1cf), region = 40  ;;  %347 = vmatprep.mubr.f32.mxu0 (!%p209_p3), %v620_v0  ;;  %593 = vset.pattern.permute.xlu0 (!%p209_p3), %v621_v1  ;;  %v358_v3 = vld [vmem:[%s711_s4] sm:$0xff] (!%p209_p3)  ;;  %v359_v7 = vld [vmem:[%s711_s4 + $0x8] sm:$0xff] (!%p209_p3)  ;;  %vm370_vm2 = vcmask (!%p209_p3), 64512  }
   0x8   : > { %269 = vperm.xlu0 (!%p209_p3), %593, %v266_v2   ;;  %441 = vmatprep.mubr.f32.mxu1 (!%p209_p3), %v620_v0  ;;  %v265_v6 = vld [vmem:[%s708_s1] sm:$0xff] (!%p209_p3)  ;;  %v357_v16 = vld [vmem:[%s710_s3 + $0x8] sm:$0xff] (!%p209_p3) }
   0x9   : > { %594 = vset.pattern.permute.xlu1 (!%p209_p3), %v621_v1  ;;  %v356_v15 = vld [vmem:[%s710_s3] sm:$0xff] (!%p209_p3) }
   0xa   : > { %367 = vperm.xlu1 (!%p209_p3), %594, %v359_v7  }
   0xc   : > { %362 = vperm.xlu0 (!%p209_p3), %593, %v358_v3  }
   0xe   : > { %s718_s18 = smov (!%p245_p4, %s610_s18), 1 }
   0xf   : > { %s565_s26 = sshll.u32 %s718_s18, 3  ;;  %s566_s13 = sshll.u32 %s718_s18, 5 }
  0x10   : > { %s252_s29 = scalar_lea.vmem %s707_s0, %s565_s26  ;;  %s262_s16 = scalar_lea.vmem %s712_s5, %s566_s13 }
  0x11   : > { %v264_v4 = vld [vmem:[%s252_s29] sm:$0xff] }
  0x12   : > { %v273_v5 = vcombine.high %v264_v4, %v264_v4 }
  0x14   : > { %558 = vmatprep.subr.msk.mxu0 %vm278_vm0, %v273_v5 }
  0x15   : > { %559 = vmatpush1.msk.msra.mxu0 %vm278_vm0, %v264_v4 }
  0x16   : > { %560 = vmatmul.mubr.msk.f32.vlgmr.msra.gmra.mrb[0].mxu0 %vm274_vm1, %v265_v6 }
  0x87   : > { %v270_v8 = vpop.permute.xlu0 %269 }
  0x89   : > { %v368_v22 = vpop.permute.xlu1 %367 }
  0x8b   : > { %v363_v17 = vpop.permute.xlu0 %362 }
  0xe9   : > { %v349_v9 = vpop.f32.mrb[0].mxu0 }
  0xea   : > { %v350_v10 = vadd.f32 %v349_v9, %v270_v8  ;;  %v351_v11 = vpop.f32.mrb[1].mxu0 }
  0xeb   : > { %v352_v12 = vadd.f32 %v351_v11, %v270_v8 }
  0xec   : > { %v354_v14 = vmax.f32 %v350_v10, 0.0 }
  0xed   : > { %v355_v13 = vmax.f32 %v352_v12, 0.0 }
  0xef   : > { %377 = vmatprep.subr.mxu1 %v355_v13 }
  0xf0   : > { %378 = vmatpush1.msra.mxu1 %v354_v14 }
  0xf1   : > { %561 = vmatmul.mubr.msk.f32.vlgmr.msra.gmra.mrb[0].mxu1 %vm370_vm2, %v356_v15 }
  0xf2   : > { %447 = vmatprep.mubr.f32.mxu1 %v620_v0 }
  0xf5   : > { %562 = vmatmul.mubr.msk.f32.gmra.mrb[2].mxu1 %vm370_vm2, %v357_v16 }
 0x1c4   : > { %v443_v18 = vpop.f32.mrb[0].mxu1 }
 0x1c5   : > { %v444_v19 = vadd.f32 %v443_v18, %v363_v17  ;;  %v445_v20 = vpop.f32.mrb[1].mxu1 }
 0x1c6   : > { %v446_v21 = vadd.f32 %v445_v20, %v363_v17 }
 0x1c7   : > { %v454_v23 = vmax.f32 %v444_v19, 0.0 }
 0x1c8   : > { %v455_v24 = vmax.f32 %v446_v21, 0.0  ;;  %v449_v25 = vpop.f32.mrb[2].mxu1 }
 0x1c9   : > { %458 = vst [vmem:[%s262_s16] sm:$0xff] %v454_v23  ;;  %v450_v26 = vadd.f32 %v449_v25, %v368_v22  ;;  %v451_v27 = vpop.f32.mrb[3].mxu1 }
 0x1ca   : > { %459 = vst [vmem:[%s262_s16 + $0x8] sm:$0xff] %v455_v24  ;;  %v452_v28 = vadd.f32 %v451_v27, %v368_v22 }
 0x1cb   : > { %v456_v29 = vmax.f32 %v450_v26, 0.0 }
 0x1cc   : > { %v457_v30 = vmax.f32 %v452_v28, 0.0 }
 0x1cd   : > { %460 = vst [vmem:[%s262_s16 + $0x10] sm:$0xff] %v456_v29 }
 0x1ce   : > { %461 = vst [vmem:[%s262_s16 + $0x18] sm:$0xff] %v457_v30 }
 0x1cf PF: > { %s15_s20 = sadd.s32 1, %s618_s20   ;;  %s713_s18 = smov %s614_s19 }
 0x1d0   : > { %p12_p5 = scmp.ge.s32.totalorder %s15_s20, 4   ;;  %s714_s19 = smov %s716_s21 }
 0x1d2   :  { %14 = sbr.rel (!%p12_p5) target bundleno = 2 (0x2), region = 70 }

</bundles_post_ra>
